<compile_context>
chip_gen: v7x
topology: tpu7x:2x2x1
jax: 0.10.0
libtpu: 0.0.40
codegen_flags: <defaults>
</compile_context>

<pallas_src>
import jax
import jax.numpy as jnp
from jax.experimental import pallas as pl
from jax.experimental.pallas import tpu as pltpu


def _round_up(n, m):
    return ((n + m - 1) // m) * m


def _sigmoid(x):
    # single-transcendental sigmoid: one EUP tanh push instead of exp + reciprocal.
    return 0.5 * jnp.tanh(0.5 * x) + 0.5


# ------------------------------------------------------------------ kernel ---

def bilstm_kernel(x_ref,
                  w1_ref, b1_ref,
                  wl0_ref, bl0_ref,
                  wl1_ref, bl1_ref,
                  wfc1_ref, bfc1_ref,
                  wfc2_ref, bfc2_ref,
                  wfc3_ref, bfc3_ref,
                  out_ref):
    # Everything is feature-major: activations are (features, batch_tile).
    def mm(w_ref, act, b_ref):
        # bf16 x bf16 on the MXU, f32 accumulate, f32 column-bias add.
        return jnp.dot(w_ref[...], act.astype(jnp.bfloat16),
                       preferred_element_type=jnp.float32) + b_ref[...]

    x = x_ref[...]                                            # (in, tb) bf16

    # feature_preprocessing: Linear (+folded BN) -> ReLU -> Dropout(identity)
    h = jnp.maximum(mm(w1_ref, x, b1_ref), 0.0)               # (H, tb) f32

    # one bidirectional LSTM layer, seq_len == 1, h0 = c0 = 0.
    # fused gate layout (rows): [i_fwd|i_bwd, g_fwd|g_bwd, o_fwd|o_bwd], each Cp rows,
    # Cp = round_up(2*Hd, 8) -> the chunk slices below are sublane-tile-aligned free views.
    def bilstm_layer(inp, w_ref, b_ref):
        g = mm(w_ref, inp, b_ref)                             # (3*Cp, tb) f32
        c = g.shape[0] // 3                                    # c == Cp
        i = _sigmoid(g[:c])
        gg = jnp.tanh(g[c:2 * c])
        o = _sigmoid(g[2 * c:])
        return o * jnp.tanh(i * gg)                            # rows = concat(h_fwd, h_bwd)

    l0 = bilstm_layer(h, wl0_ref, bl0_ref)                     # (Cp, tb)
    l1 = bilstm_layer(l0, wl1_ref, bl1_ref)                    # (Cp, tb)

    # fc_layers (BN folded into the Linear weights)
    y = jnp.maximum(mm(wfc1_ref, l1, bfc1_ref), 0.0)           # (H, tb)
    y = jnp.maximum(mm(wfc2_ref, y, bfc2_ref), 0.0)            # (Hd, tb)

    # final Linear(Hd -> 1): VPU multiply + sublane reduction -> lane-dense (1, tb) row.
    z = jnp.sum(y * wfc3_ref[...], axis=0, keepdims=True) + bfc3_ref[...]   # (1, tb)
    out_ref[...] = _sigmoid(z)


# ----------------------------------------------------------------- wrapper ---

# Safe everywhere (incl. v7x 64 MiB VMEM).  On 128 MiB v5e/v6e this can be raised to
# 4096-8192 through the batch_tile argument for very large batches.
DEFAULT_BATCH_TILE_CAP = 2048


def _pick_tile(B, cap):
    """Pick (batch_tile, padded_B).  Multi-step tiles are multiples of 128 (lane-dense);
    whenever the batch is big enough we guarantee >= 2 grid steps so the 'parallel' grid
    axis can shard batch tiles across both v7x TensorCores."""
    cap = max(128, _round_up(int(cap), 128))
    b_rounded = _round_up(B, 8)
    if b_rounded <= 256:                 # too small to split into two >=128-row tiles
        return b_rounded, b_rounded      # single grid step, tile == full (padded) batch
    steps = max(2, -(-B // cap))
    tile = min(cap, _round_up(-(-B // steps), 128))
    return tile, _round_up(B, tile)


def _vmem_limit_bytes(kparams, in_dim, tile):
    """Footprint-derived scoped-VMEM request (weights + double-buffered tiles + a generous
    over-estimate of live f32 intermediates), instead of a flat 48 MiB."""
    wbytes = sum(int(p.size) * jnp.dtype(p.dtype).itemsize for p in kparams)
    x_tile = in_dim * tile * 2           # bf16 input tile
    out_tile = tile * 4                  # f32 output row
    H = kparams[0].shape[0]
    cp3 = kparams[2].shape[0]            # 3 * Cp
    hd = kparams[8].shape[0]
    per_col = (H + cp3 + cp3 // 3 + cp3 + cp3 // 3 + H + hd) * 4
    est = 2 * wbytes + 2 * x_tile + 2 * out_tile + 2 * per_col * tile + (4 << 20)
    return int(min(max(est, 8 << 20), 56 << 20))


def bilstm_forward(x, kparams, *, batch_tile=None, interpret=False):
    """x: (B, input_size) or (input_size,) float32. Returns the squeezed sigmoid output."""
    if x.ndim == 1:
        x = x[None, :]
    B, in_dim = x.shape

    tile, padded_b = _pick_tile(B, batch_tile or DEFAULT_BATCH_TILE_CAP)
    num_steps = padded_b // tile

    # feature-major input (in_dim, B), bf16 (halves streamed bytes; matmul operands are bf16)
    xt = x.T.astype(jnp.bfloat16)
    if padded_b != B:
        xt = jnp.pad(xt, ((0, 0), (0, padded_b - B)))

    x_spec = pl.BlockSpec((in_dim, tile), lambda i: (0, i))
    # lane-dense output: one (1, tile) row per grid step into a (1, padded_b) slab.
    out_spec = pl.BlockSpec((1, tile), lambda i: (0, i))
    # weights/biases: full-array blocks with constant index maps -> fetched once,
    # VMEM-resident across all batch-grid steps.
    w_specs = [pl.BlockSpec(p.shape, lambda i: (0, 0)) for p in kparams]

    out = pl.pallas_call(
        bilstm_kernel,
        out_shape=jax.ShapeDtypeStruct((1, padded_b), jnp.float32),
        grid=(num_steps,),
        in_specs=[x_spec] + w_specs,
        out_specs=out_spec,
        compiler_params=pltpu.CompilerParams(
            dimension_semantics=("parallel",),            # shards batch tiles across TCs (v7x)
            vmem_limit_bytes=_vmem_limit_bytes(kparams, in_dim, tile)),
        interpret=interpret,
    )(xt, *kparams)

    return jnp.squeeze(out[0, :B])                         # matches torch .squeeze()


# -------------------------------------------------- raw (PyTorch-style) params ---

def make_raw_params(key, input_size, hidden_size):
    """Deterministic synthetic parameters in the original PyTorch layout (f32, BN running stats)."""
    H = hidden_size
    Hd = H // 2
    keys = iter(jax.random.split(key, 128))

    def u(shape, bound):
        return jax.random.uniform(next(keys), shape, jnp.float32, -bound, bound)

    def bn(n):
        return dict(
            gamma=1.0 + 0.1 * jax.random.normal(next(keys), (n,), jnp.float32),
            beta=0.1 * jax.random.normal(next(keys), (n,), jnp.float32),
            mean=0.05 * jax.random.normal(next(keys), (n,), jnp.float32),
            var=1.0 + 0.1 * jnp.abs(jax.random.normal(next(keys), (n,), jnp.float32)),
        )

    p = {}
    b = 1.0 / (input_size ** 0.5)
    p["lin1_w"] = u((H, input_size), b)
    p["lin1_b"] = u((H,), b)
    p["bn1"] = bn(H)

    def lstm_dir(in_dim):
        bb = 1.0 / (Hd ** 0.5)
        return dict(w_ih=u((4 * Hd, in_dim), bb), w_hh=u((4 * Hd, Hd), bb),
                    b_ih=u((4 * Hd,), bb), b_hh=u((4 * Hd,), bb))

    p["lstm0_f"] = lstm_dir(H)
    p["lstm0_b"] = lstm_dir(H)
    p["lstm1_f"] = lstm_dir(2 * Hd)
    p["lstm1_b"] = lstm_dir(2 * Hd)

    b = 1.0 / (H ** 0.5)
    p["fc1_w"] = u((H, H), b)
    p["fc1_b"] = u((H,), b)
    p["bn2"] = bn(H)
    p["fc2_w"] = u((Hd, H), b)
    p["fc2_b"] = u((Hd,), b)
    p["bn3"] = bn(Hd)
    b = 1.0 / (Hd ** 0.5)
    p["fc3_w"] = u((1, Hd), b)
    p["fc3_b"] = u((1,), b)
    return p


# ------------------------------------------------------ kernel-param folding ---

def fold_params(p, eps=1e-5):
    """BN folding, bidirectional-LSTM gate fusion (drop forget gate / W_hh), feature-major
    (out, in) weight layout, bf16 weight cast, column (out, 1) f32 biases."""

    def bn_fold(w, b, s, in_pad=None):
        scale = s["gamma"] / jnp.sqrt(s["var"] + eps)
        shift = s["beta"] - s["mean"] * scale
        wf = w * scale[:, None]                                # (out, in)
        if in_pad is not None and in_pad > wf.shape[1]:
            wf = jnp.pad(wf, ((0, 0), (0, in_pad - wf.shape[1])))
        bf = (b * scale + shift)[:, None]                      # (out, 1)
        return wf.astype(jnp.bfloat16), bf.astype(jnp.float32)

    def lstm_fuse(df, db, in_pad=None):
        Hd = df["w_hh"].shape[1]
        Cp = _round_up(2 * Hd, 8)                              # sublane-aligned chunk width

        def gate(d, g):
            w = d["w_ih"][g * Hd:(g + 1) * Hd]                 # (Hd, in)
            b = (d["b_ih"] + d["b_hh"])[g * Hd:(g + 1) * Hd]   # h0 == 0 -> biases combine
            return w, b

        w_rows, b_rows = [], []
        for g in (0, 2, 3):                                    # i, g, o (f gate * c0==0 dropped)
            ws, bs = [], []
            for d in (df, db):
                w, b = gate(d, g)
                ws.append(w)
                bs.append(b)
            wg = jnp.concatenate(ws, axis=0)                   # (2*Hd, in)
            bg = jnp.concatenate(bs, axis=0)
            if Cp > 2 * Hd:                                    # zero pad -> pad rows of h are 0
                wg = jnp.pad(wg, ((0, Cp - 2 * Hd), (0, 0)))
                bg = jnp.pad(bg, (0, Cp - 2 * Hd))
            w_rows.append(wg)
            b_rows.append(bg)
        W = jnp.concatenate(w_rows, axis=0)                    # (3*Cp, in)
        if in_pad is not None and in_pad > W.shape[1]:
            W = jnp.pad(W, ((0, 0), (0, in_pad - W.shape[1])))
        B = jnp.concatenate(b_rows, axis=0)[:, None]           # (3*Cp, 1)
        return W.astype(jnp.bfloat16), B.astype(jnp.float32), Cp

    w1, b1 = bn_fold(p["lin1_w"], p["lin1_b"], p["bn1"])
    wl0, bl0, Cp = lstm_fuse(p["lstm0_f"], p["lstm0_b"])
    wl1, bl1, _ = lstm_fuse(p["lstm1_f"], p["lstm1_b"], in_pad=Cp)
    wfc1, bfc1 = bn_fold(p["fc1_w"], p["fc1_b"], p["bn2"], in_pad=Cp)
    wfc2, bfc2 = bn_fold(p["fc2_w"], p["fc2_b"], p["bn3"])
    wfc3 = p["fc3_w"].reshape(-1, 1).astype(jnp.float32)       # (Hd, 1), used on the VPU
    bfc3 = p["fc3_b"].reshape(1, 1).astype(jnp.float32)        # (1, 1)

    return [w1, b1, wl0, bl0, wl1, bl1, wfc1, bfc1, wfc2, bfc2, wfc3, bfc3]


# ------------------------------------------------------ pure-JAX f32 reference ---

def reference_forward(x, p, eps=1e-5):
    """Textbook eval-mode forward of the original module (full gates, zero init state)."""
    if x.ndim == 1:
        x = x[None, :]

    def bn(v, s):
        return (v - s["mean"]) / jnp.sqrt(s["var"] + eps) * s["gamma"] + s["beta"]

    def lstm_cell(inp, d):
        Hd = d["w_hh"].shape[1]
        h0 = jnp.zeros((inp.shape[0], Hd), jnp.float32)
        c0 = jnp.zeros_like(h0)
        g = inp @ d["w_ih"].T + h0 @ d["w_hh"].T + d["b_ih"] + d["b_hh"]
        i = jax.nn.sigmoid(g[:, 0 * Hd:1 * Hd])
        f = jax.nn.sigmoid(g[:, 1 * Hd:2 * Hd])
        gg = jnp.tanh(g[:, 2 * Hd:3 * Hd])
        o = jax.nn.sigmoid(g[:, 3 * Hd:4 * Hd])
        c = f * c0 + i * gg
        return o * jnp.tanh(c)

    h = jnp.maximum(bn(x @ p["lin1_w"].T + p["lin1_b"], p["bn1"]), 0.0)
    l0 = jnp.concatenate([lstm_cell(h, p["lstm0_f"]), lstm_cell(h, p["lstm0_b"])], -1)
    l1 = jnp.concatenate([lstm_cell(l0, p["lstm1_f"]), lstm_cell(l0, p["lstm1_b"])], -1)
    y = jnp.maximum(bn(l1 @ p["fc1_w"].T + p["fc1_b"], p["bn2"]), 0.0)
    y = jnp.maximum(bn(y @ p["fc2_w"].T + p["fc2_b"], p["bn3"]), 0.0)
    return jnp.squeeze(jax.nn.sigmoid(y @ p["fc3_w"].T + p["fc3_b"]))


# --------------------------------------------------------------------- main ---

if __name__ == "__main__":
    INPUT_SIZE = 16
    HIDDEN = 32        # small stand-in for the module's default 128 (Hd = 16)
    BATCH = 8

    key = jax.random.PRNGKey(0)
    kx, kp = jax.random.split(key)
    x = jax.random.normal(kx, (BATCH, INPUT_SIZE), jnp.float32)

    raw_params = make_raw_params(kp, INPUT_SIZE, HIDDEN)
    kparams = fold_params(raw_params)

    out = jax.block_until_ready(bilstm_forward(x, kparams))
    ref = reference_forward(x, raw_params)

    assert out.shape == (BATCH,), out.shape
    # bf16 weights/activations in the matmuls (f32 accumulate) vs a pure-f32 reference.
    assert jnp.allclose(out, ref, atol=2e-2, rtol=2e-2), (out, ref)

    print("KERNEL_OK")
</pallas_src>

<mosaic_0001>
module attributes {stable_mosaic.version = 11 : i64} {
  func.func @bilstm_kernel(%arg0: i32, %arg1: memref<16x8xbf16, #tpu.memory_space<vmem>>, %arg2: memref<32x16xbf16, #tpu.memory_space<vmem>>, %arg3: memref<32x1xf32, #tpu.memory_space<vmem>>, %arg4: memref<96x32xbf16, #tpu.memory_space<vmem>>, %arg5: memref<96x1xf32, #tpu.memory_space<vmem>>, %arg6: memref<96x32xbf16, #tpu.memory_space<vmem>>, %arg7: memref<96x1xf32, #tpu.memory_space<vmem>>, %arg8: memref<32x32xbf16, #tpu.memory_space<vmem>>, %arg9: memref<32x1xf32, #tpu.memory_space<vmem>>, %arg10: memref<16x32xbf16, #tpu.memory_space<vmem>>, %arg11: memref<16x1xf32, #tpu.memory_space<vmem>>, %arg12: memref<16x1xf32, #tpu.memory_space<vmem>>, %arg13: memref<1x1xf32, #tpu.memory_space<vmem>>, %arg14: memref<1x8xf32, #tpu.memory_space<vmem>>) attributes {dimension_semantics = [#tpu.dimension_semantics<parallel>], iteration_bounds = array<i64: 1>, scalar_prefetch = 0 : i64, scratch_operands = 0 : i64, tpu.core_type = #tpu.core_type<tc>, window_params = [{transform_indices = @transform_0, window_bounds = array<i64: 16, 8>}, {pipeline_mode = #tpu.pipeline_mode<synchronous>, transform_indices = @transform_1, window_bounds = array<i64: 32, 16>}, {pipeline_mode = #tpu.pipeline_mode<synchronous>, transform_indices = @transform_2, window_bounds = array<i64: 32, 1>}, {pipeline_mode = #tpu.pipeline_mode<synchronous>, transform_indices = @transform_3, window_bounds = array<i64: 96, 32>}, {pipeline_mode = #tpu.pipeline_mode<synchronous>, transform_indices = @transform_4, window_bounds = array<i64: 96, 1>}, {pipeline_mode = #tpu.pipeline_mode<synchronous>, transform_indices = @transform_5, window_bounds = array<i64: 96, 32>}, {pipeline_mode = #tpu.pipeline_mode<synchronous>, transform_indices = @transform_6, window_bounds = array<i64: 96, 1>}, {pipeline_mode = #tpu.pipeline_mode<synchronous>, transform_indices = @transform_7, window_bounds = array<i64: 32, 32>}, {pipeline_mode = #tpu.pipeline_mode<synchronous>, transform_indices = @transform_8, window_bounds = array<i64: 32, 1>}, {pipeline_mode = #tpu.pipeline_mode<synchronous>, transform_indices = @transform_9, window_bounds = array<i64: 16, 32>}, {pipeline_mode = #tpu.pipeline_mode<synchronous>, transform_indices = @transform_10, window_bounds = array<i64: 16, 1>}, {pipeline_mode = #tpu.pipeline_mode<synchronous>, transform_indices = @transform_11, window_bounds = array<i64: 16, 1>}, {pipeline_mode = #tpu.pipeline_mode<synchronous>, transform_indices = @transform_12, window_bounds = array<i64: 1, 1>}, {transform_indices = @transform_13, window_bounds = array<i64: 1, 8>}]} {
    %c0 = arith.constant 0 : index
    %c0_0 = arith.constant 0 : index
    %0 = vector.load %arg1[%c0, %c0_0] : memref<16x8xbf16, #tpu.memory_space<vmem>>, vector<16x8xbf16>
    %c0_1 = arith.constant 0 : index
    %c0_2 = arith.constant 0 : index
    %1 = vector.load %arg2[%c0_1, %c0_2] : memref<32x16xbf16, #tpu.memory_space<vmem>>, vector<32x16xbf16>
    %cst = arith.constant dense<0.000000e+00> : vector<32x8xf32>
    %2 = tpu.matmul %1, %0, %cst {dimension_numbers = #tpu.dot_dimension_numbers<[1], [0], [0], [1], [0, 0, 1, 1], [], []>} : vector<32x16xbf16>, vector<16x8xbf16>, vector<32x8xf32> -> vector<32x8xf32>
    %c0_3 = arith.constant 0 : index
    %c0_4 = arith.constant 0 : index
    %3 = vector.load %arg3[%c0_3, %c0_4] : memref<32x1xf32, #tpu.memory_space<vmem>>, vector<32x1xf32>
    %4 = vector.broadcast %3 : vector<32x1xf32> to vector<32x8xf32>
    %5 = arith.addf %2, %4 : vector<32x8xf32>
    %cst_5 = arith.constant 0.000000e+00 : f32
    %6 = vector.broadcast %cst_5 : f32 to vector<32x8xf32>
    %7 = arith.maximumf %5, %6 : vector<32x8xf32>
    %c0_6 = arith.constant 0 : index
    %c0_7 = arith.constant 0 : index
    %8 = vector.load %arg4[%c0_6, %c0_7] : memref<96x32xbf16, #tpu.memory_space<vmem>>, vector<96x32xbf16>
    %9 = arith.truncf %7 : vector<32x8xf32> to vector<32x8xbf16>
    %cst_8 = arith.constant dense<0.000000e+00> : vector<96x8xf32>
    %10 = tpu.matmul %8, %9, %cst_8 {dimension_numbers = #tpu.dot_dimension_numbers<[1], [0], [0], [1], [0, 0, 1, 1], [], []>} : vector<96x32xbf16>, vector<32x8xbf16>, vector<96x8xf32> -> vector<96x8xf32>
    %c0_9 = arith.constant 0 : index
    %c0_10 = arith.constant 0 : index
    %11 = vector.load %arg5[%c0_9, %c0_10] : memref<96x1xf32, #tpu.memory_space<vmem>>, vector<96x1xf32>
    %12 = vector.broadcast %11 : vector<96x1xf32> to vector<96x8xf32>
    %13 = arith.addf %10, %12 : vector<96x8xf32>
    %14 = vector.extract_strided_slice %13 {offsets = [0, 0], sizes = [32, 8], strides = [1, 1]} : vector<96x8xf32> to vector<32x8xf32>
    %cst_11 = arith.constant 5.000000e-01 : f32
    %15 = vector.broadcast %cst_11 : f32 to vector<32x8xf32>
    %16 = arith.mulf %15, %14 : vector<32x8xf32>
    %17 = math.tanh %16 : vector<32x8xf32>
    %cst_12 = arith.constant 5.000000e-01 : f32
    %18 = vector.broadcast %cst_12 : f32 to vector<32x8xf32>
    %19 = arith.mulf %18, %17 : vector<32x8xf32>
    %cst_13 = arith.constant 5.000000e-01 : f32
    %20 = vector.broadcast %cst_13 : f32 to vector<32x8xf32>
    %21 = arith.addf %19, %20 : vector<32x8xf32>
    %22 = vector.extract_strided_slice %13 {offsets = [32, 0], sizes = [32, 8], strides = [1, 1]} : vector<96x8xf32> to vector<32x8xf32>
    %23 = math.tanh %22 : vector<32x8xf32>
    %24 = vector.extract_strided_slice %13 {offsets = [64, 0], sizes = [32, 8], strides = [1, 1]} : vector<96x8xf32> to vector<32x8xf32>
    %cst_14 = arith.constant 5.000000e-01 : f32
    %25 = vector.broadcast %cst_14 : f32 to vector<32x8xf32>
    %26 = arith.mulf %25, %24 : vector<32x8xf32>
    %27 = math.tanh %26 : vector<32x8xf32>
    %cst_15 = arith.constant 5.000000e-01 : f32
    %28 = vector.broadcast %cst_15 : f32 to vector<32x8xf32>
    %29 = arith.mulf %28, %27 : vector<32x8xf32>
    %cst_16 = arith.constant 5.000000e-01 : f32
    %30 = vector.broadcast %cst_16 : f32 to vector<32x8xf32>
    %31 = arith.addf %29, %30 : vector<32x8xf32>
    %32 = arith.mulf %21, %23 : vector<32x8xf32>
    %33 = math.tanh %32 : vector<32x8xf32>
    %34 = arith.mulf %31, %33 : vector<32x8xf32>
    %c0_17 = arith.constant 0 : index
    %c0_18 = arith.constant 0 : index
    %35 = vector.load %arg6[%c0_17, %c0_18] : memref<96x32xbf16, #tpu.memory_space<vmem>>, vector<96x32xbf16>
    %36 = arith.truncf %34 : vector<32x8xf32> to vector<32x8xbf16>
    %cst_19 = arith.constant dense<0.000000e+00> : vector<96x8xf32>
    %37 = tpu.matmul %35, %36, %cst_19 {dimension_numbers = #tpu.dot_dimension_numbers<[1], [0], [0], [1], [0, 0, 1, 1], [], []>} : vector<96x32xbf16>, vector<32x8xbf16>, vector<96x8xf32> -> vector<96x8xf32>
    %c0_20 = arith.constant 0 : index
    %c0_21 = arith.constant 0 : index
    %38 = vector.load %arg7[%c0_20, %c0_21] : memref<96x1xf32, #tpu.memory_space<vmem>>, vector<96x1xf32>
    %39 = vector.broadcast %38 : vector<96x1xf32> to vector<96x8xf32>
    %40 = arith.addf %37, %39 : vector<96x8xf32>
    %41 = vector.extract_strided_slice %40 {offsets = [0, 0], sizes = [32, 8], strides = [1, 1]} : vector<96x8xf32> to vector<32x8xf32>
    %cst_22 = arith.constant 5.000000e-01 : f32
    %42 = vector.broadcast %cst_22 : f32 to vector<32x8xf32>
    %43 = arith.mulf %42, %41 : vector<32x8xf32>
    %44 = math.tanh %43 : vector<32x8xf32>
    %cst_23 = arith.constant 5.000000e-01 : f32
    %45 = vector.broadcast %cst_23 : f32 to vector<32x8xf32>
    %46 = arith.mulf %45, %44 : vector<32x8xf32>
    %cst_24 = arith.constant 5.000000e-01 : f32
    %47 = vector.broadcast %cst_24 : f32 to vector<32x8xf32>
    %48 = arith.addf %46, %47 : vector<32x8xf32>
    %49 = vector.extract_strided_slice %40 {offsets = [32, 0], sizes = [32, 8], strides = [1, 1]} : vector<96x8xf32> to vector<32x8xf32>
    %50 = math.tanh %49 : vector<32x8xf32>
    %51 = vector.extract_strided_slice %40 {offsets = [64, 0], sizes = [32, 8], strides = [1, 1]} : vector<96x8xf32> to vector<32x8xf32>
    %cst_25 = arith.constant 5.000000e-01 : f32
    %52 = vector.broadcast %cst_25 : f32 to vector<32x8xf32>
    %53 = arith.mulf %52, %51 : vector<32x8xf32>
    %54 = math.tanh %53 : vector<32x8xf32>
    %cst_26 = arith.constant 5.000000e-01 : f32
    %55 = vector.broadcast %cst_26 : f32 to vector<32x8xf32>
    %56 = arith.mulf %55, %54 : vector<32x8xf32>
    %cst_27 = arith.constant 5.000000e-01 : f32
    %57 = vector.broadcast %cst_27 : f32 to vector<32x8xf32>
    %58 = arith.addf %56, %57 : vector<32x8xf32>
    %59 = arith.mulf %48, %50 : vector<32x8xf32>
    %60 = math.tanh %59 : vector<32x8xf32>
    %61 = arith.mulf %58, %60 : vector<32x8xf32>
    %c0_28 = arith.constant 0 : index
    %c0_29 = arith.constant 0 : index
    %62 = vector.load %arg8[%c0_28, %c0_29] : memref<32x32xbf16, #tpu.memory_space<vmem>>, vector<32x32xbf16>
    %63 = arith.truncf %61 : vector<32x8xf32> to vector<32x8xbf16>
    %cst_30 = arith.constant dense<0.000000e+00> : vector<32x8xf32>
    %64 = tpu.matmul %62, %63, %cst_30 {dimension_numbers = #tpu.dot_dimension_numbers<[1], [0], [0], [1], [0, 0, 1, 1], [], []>} : vector<32x32xbf16>, vector<32x8xbf16>, vector<32x8xf32> -> vector<32x8xf32>
    %c0_31 = arith.constant 0 : index
    %c0_32 = arith.constant 0 : index
    %65 = vector.load %arg9[%c0_31, %c0_32] : memref<32x1xf32, #tpu.memory_space<vmem>>, vector<32x1xf32>
    %66 = vector.broadcast %65 : vector<32x1xf32> to vector<32x8xf32>
    %67 = arith.addf %64, %66 : vector<32x8xf32>
    %cst_33 = arith.constant 0.000000e+00 : f32
    %68 = vector.broadcast %cst_33 : f32 to vector<32x8xf32>
    %69 = arith.maximumf %67, %68 : vector<32x8xf32>
    %c0_34 = arith.constant 0 : index
    %c0_35 = arith.constant 0 : index
    %70 = vector.load %arg10[%c0_34, %c0_35] : memref<16x32xbf16, #tpu.memory_space<vmem>>, vector<16x32xbf16>
    %71 = arith.truncf %69 : vector<32x8xf32> to vector<32x8xbf16>
    %cst_36 = arith.constant dense<0.000000e+00> : vector<16x8xf32>
    %72 = tpu.matmul %70, %71, %cst_36 {dimension_numbers = #tpu.dot_dimension_numbers<[1], [0], [0], [1], [0, 0, 1, 1], [], []>} : vector<16x32xbf16>, vector<32x8xbf16>, vector<16x8xf32> -> vector<16x8xf32>
    %c0_37 = arith.constant 0 : index
    %c0_38 = arith.constant 0 : index
    %73 = vector.load %arg11[%c0_37, %c0_38] : memref<16x1xf32, #tpu.memory_space<vmem>>, vector<16x1xf32>
    %74 = vector.broadcast %73 : vector<16x1xf32> to vector<16x8xf32>
    %75 = arith.addf %72, %74 : vector<16x8xf32>
    %cst_39 = arith.constant 0.000000e+00 : f32
    %76 = vector.broadcast %cst_39 : f32 to vector<16x8xf32>
    %77 = arith.maximumf %75, %76 : vector<16x8xf32>
    %c0_40 = arith.constant 0 : index
    %c0_41 = arith.constant 0 : index
    %78 = vector.load %arg12[%c0_40, %c0_41] : memref<16x1xf32, #tpu.memory_space<vmem>>, vector<16x1xf32>
    %79 = vector.broadcast %78 : vector<16x1xf32> to vector<16x8xf32>
    %80 = arith.mulf %77, %79 : vector<16x8xf32>
    %cst_42 = arith.constant dense<0.000000e+00> : vector<8xf32>
    %81 = vector.multi_reduction <add>, %80, %cst_42 [0] : vector<16x8xf32> to vector<8xf32>
    %82 = vector.shape_cast %81 : vector<8xf32> to vector<1x8xf32>
    %c0_43 = arith.constant 0 : index
    %c0_44 = arith.constant 0 : index
    %83 = vector.load %arg13[%c0_43, %c0_44] : memref<1x1xf32, #tpu.memory_space<vmem>>, vector<1x1xf32>
    %84 = vector.broadcast %83 : vector<1x1xf32> to vector<1x8xf32>
    %85 = arith.addf %82, %84 : vector<1x8xf32>
    %cst_45 = arith.constant 5.000000e-01 : f32
    %86 = vector.broadcast %cst_45 : f32 to vector<1x8xf32>
    %87 = arith.mulf %86, %85 : vector<1x8xf32>
    %88 = math.tanh %87 : vector<1x8xf32>
    %cst_46 = arith.constant 5.000000e-01 : f32
    %89 = vector.broadcast %cst_46 : f32 to vector<1x8xf32>
    %90 = arith.mulf %89, %88 : vector<1x8xf32>
    %cst_47 = arith.constant 5.000000e-01 : f32
    %91 = vector.broadcast %cst_47 : f32 to vector<1x8xf32>
    %92 = arith.addf %90, %91 : vector<1x8xf32>
    %c0_48 = arith.constant 0 : index
    %c0_49 = arith.constant 0 : index
    %93 = vector.load %arg14[%c0_48, %c0_49] : memref<1x8xf32, #tpu.memory_space<vmem>>, vector<1x8xf32>
    tpu.vector_store %arg14[%c0_48, %c0_49], %92 {strides = array<i32>} : memref<1x8xf32, #tpu.memory_space<vmem>>, vector<1x8xf32>,
    return
  }
  func.func @transform_0(%arg0: i32) -> (i32, i32) {
    %c0_i32 = arith.constant 0 : i32
    %c0_i32_0 = arith.constant 0 : i32
    return %c0_i32, %arg0 : i32, i32
  }
  func.func @transform_1(%arg0: i32) -> (i32, i32) {
    %c0_i32 = arith.constant 0 : i32
    %c0_i32_0 = arith.constant 0 : i32
    %c0_i32_1 = arith.constant 0 : i32
    return %c0_i32, %c0_i32_0 : i32, i32
  }
  func.func @transform_2(%arg0: i32) -> (i32, i32) {
    %c0_i32 = arith.constant 0 : i32
    %c0_i32_0 = arith.constant 0 : i32
    %c0_i32_1 = arith.constant 0 : i32
    return %c0_i32, %c0_i32_0 : i32, i32
  }
  func.func @transform_3(%arg0: i32) -> (i32, i32) {
    %c0_i32 = arith.constant 0 : i32
    %c0_i32_0 = arith.constant 0 : i32
    %c0_i32_1 = arith.constant 0 : i32
    return %c0_i32, %c0_i32_0 : i32, i32
  }
  func.func @transform_4(%arg0: i32) -> (i32, i32) {
    %c0_i32 = arith.constant 0 : i32
    %c0_i32_0 = arith.constant 0 : i32
    %c0_i32_1 = arith.constant 0 : i32
    return %c0_i32, %c0_i32_0 : i32, i32
  }
  func.func @transform_5(%arg0: i32) -> (i32, i32) {
    %c0_i32 = arith.constant 0 : i32
    %c0_i32_0 = arith.constant 0 : i32
    %c0_i32_1 = arith.constant 0 : i32
    return %c0_i32, %c0_i32_0 : i32, i32
  }
  func.func @transform_6(%arg0: i32) -> (i32, i32) {
    %c0_i32 = arith.constant 0 : i32
    %c0_i32_0 = arith.constant 0 : i32
    %c0_i32_1 = arith.constant 0 : i32
    return %c0_i32, %c0_i32_0 : i32, i32
  }
  func.func @transform_7(%arg0: i32) -> (i32, i32) {
    %c0_i32 = arith.constant 0 : i32
    %c0_i32_0 = arith.constant 0 : i32
    %c0_i32_1 = arith.constant 0 : i32
    return %c0_i32, %c0_i32_0 : i32, i32
  }
  func.func @transform_8(%arg0: i32) -> (i32, i32) {
    %c0_i32 = arith.constant 0 : i32
    %c0_i32_0 = arith.constant 0 : i32
    %c0_i32_1 = arith.constant 0 : i32
    return %c0_i32, %c0_i32_0 : i32, i32
  }
  func.func @transform_9(%arg0: i32) -> (i32, i32) {
    %c0_i32 = arith.constant 0 : i32
    %c0_i32_0 = arith.constant 0 : i32
    %c0_i32_1 = arith.constant 0 : i32
    return %c0_i32, %c0_i32_0 : i32, i32
  }
  func.func @transform_10(%arg0: i32) -> (i32, i32) {
    %c0_i32 = arith.constant 0 : i32
    %c0_i32_0 = arith.constant 0 : i32
    %c0_i32_1 = arith.constant 0 : i32
    return %c0_i32, %c0_i32_0 : i32, i32
  }
  func.func @transform_11(%arg0: i32) -> (i32, i32) {
    %c0_i32 = arith.constant 0 : i32
    %c0_i32_0 = arith.constant 0 : i32
    %c0_i32_1 = arith.constant 0 : i32
    return %c0_i32, %c0_i32_0 : i32, i32
  }
  func.func @transform_12(%arg0: i32) -> (i32, i32) {
    %c0_i32 = arith.constant 0 : i32
    %c0_i32_0 = arith.constant 0 : i32
    %c0_i32_1 = arith.constant 0 : i32
    return %c0_i32, %c0_i32_0 : i32, i32
  }
  func.func @transform_13(%arg0: i32) -> (i32, i32) {
    %c0_i32 = arith.constant 0 : i32
    %c0_i32_0 = arith.constant 0 : i32
    return %c0_i32, %arg0 : i32, i32
  }
}

</mosaic_0001>

<bundles_post_ra>
// kernel: tpu_custom_call.1
= control target key start
LH: loop header
LB: loop body
LE: loop exit
PB: predicated region body
PF: predicated region fallthrough
CT: control target
= control target key end

     0   :  { %s1397_s0 = inlined_call_operand.vmem [shape: bf16[16,8], index: 0, kind: input, shape index: {}]   ;;  %s1398_s1 = inlined_call_operand.vmem [shape: bf16[32,16], index: 1, kind: input, shape index: {}]   ;;  %s1399_s2 = inlined_call_operand.vmem [shape: f32[32,1], index: 2, kind: input, shape index: {}]   ;;  %s1400_s3 = inlined_call_operand.vmem [shape: bf16[96,32], index: 3, kind: input, shape index: {}]   ;;  %s1401_s4 = inlined_call_operand.vmem [shape: f32[96,1], index: 4, kind: input, shape index: {}]   ;;  %s1402_s5 = inlined_call_operand.vmem [shape: bf16[96,32], index: 5, kind: input, shape index: {}]   ;;  %s1403_s6 = inlined_call_operand.vmem [shape: f32[96,1], index: 6, kind: input, shape index: {}]   ;;  %s1404_s7 = inlined_call_operand.vmem [shape: bf16[32,32], index: 7, kind: input, shape index: {}]   ;;  %s1405_s8 = inlined_call_operand.vmem [shape: f32[32,1], index: 8, kind: input, shape index: {}]   ;;  %s1406_s9 = inlined_call_operand.vmem [shape: bf16[16,32], index: 9, kind: input, shape index: {}]   ;;  %s1407_s10 = inlined_call_operand.vmem [shape: f32[16,1], index: 10, kind: input, shape index: {}]   ;;  %s1408_s11 = inlined_call_operand.vmem [shape: f32[16,1], index: 11, kind: input, shape index: {}]   ;;  %s1409_s12 = inlined_call_operand.<no memory space> [shape: f32[1,1], index: 12, kind: input, shape index: {}]   ;;  %s1410_s13 = inlined_call_operand.hbm [shape: f32[1,8], index: 13, kind: output, shape index: {}]  }
   0x1   :  { %v18_v0 = vstv %s1409_s12 }
   0x2   :  { %19 = vst [vmem:[#allocation2] sm:$0x1] %v18_v0 }
   0x3   :  { %v1023_v1 = vld [vmem:[%s1397_s0] sm:$0xff]   ;;  %vm94_vm0 = vcmask 130048   ;;  %v1025_v3 = vld [vmem:[%s1398_s1 + $0x8] sm:$0xff]   ;;  %v1131_v4 = vmov 0   ;;  %v56_v6 = vld [vmem:[%s1399_s2 + $0x10] sm:$0xff] }
   0x4   :  { %v1024_v2 = vld [vmem:[%s1398_s1] sm:$0xff]   ;;  %963 = vmatprep.subr.bf16.mxu0 %v1023_v1  ;;  %1021 = vset.pattern.permute.xlu0 %v1131_v4  ;;  %v55_v7 = vld [vmem:[%s1399_s2 + $0x8] sm:$0xff]  ;;  %v57_v8 = vld [vmem:[%s1399_s2 + $0x18] sm:$0xff] }
   0x5   :  { %964 = vmatpush3.bf16.msra.mxu0 %v1023_v1  ;;  %965 = vmatprep.mubr.msk.bf16.mxu0 %vm94_vm0, %v1024_v2  ;;  %v54_v5 = vld [vmem:[%s1399_s2] sm:$0xff]  ;;  %v169_v10 = vld [vmem:[%s1401_s4 + $0x8] sm:$0xff]  ;;  %v170_v11 = vld [vmem:[%s1401_s4 + $0x10] sm:$0xff] }
   0x6   :  { %60 = vperm.xlu0 %1021, %v54_v5   ;;  %1022 = vset.pattern.permute.xlu1 %v1131_v4  ;;  %v168_v9 = vld [vmem:[%s1401_s4] sm:$0xff]  ;;  %v171_v12 = vld [vmem:[%s1401_s4 + $0x18] sm:$0xff]  ;;  %v173_v14 = vld [vmem:[%s1401_s4 + $0x28] sm:$0xff] }
   0x7   :  { %70 = vperm.xlu1 %1022, %v56_v6   ;;  %v172_v13 = vld [vmem:[%s1401_s4 + $0x20] sm:$0xff]  ;;  %v174_v15 = vld [vmem:[%s1401_s4 + $0x30] sm:$0xff]  ;;  %v175_v16 = vld [vmem:[%s1401_s4 + $0x38] sm:$0xff] }
   0x8   :  { %966 = vmatmul.mubr.msk.bf16.vlgmr.msra.gmra.mrb[0].mxu0 %vm94_vm0, %v1025_v3  ;;  %v176_v17 = vld [vmem:[%s1401_s4 + $0x40] sm:$0xff] }
   0xa   :  { %65 = vperm.xlu0 %1021, %v55_v7  }
   0xb   :  { %75 = vperm.xlu1 %1022, %v57_v8  }
   0xe   :  { %182 = vperm.xlu0 %1021, %v168_v9  }
   0xf   :  { %187 = vperm.xlu1 %1022, %v169_v10  }
  0x12   :  { %192 = vperm.xlu0 %1021, %v170_v11  }
  0x13   :  { %197 = vperm.xlu1 %1022, %v171_v12  }
  0x16   :  { %202 = vperm.xlu0 %1021, %v172_v13  }
  0x17   :  { %207 = vperm.xlu1 %1022, %v173_v14  }
  0x1a   :  { %212 = vperm.xlu0 %1021, %v174_v15  }
  0x1b   :  { %217 = vperm.xlu1 %1022, %v175_v16  }
  0x1c   :  { %20 = vsyncpa [#allocation4], 0  ;;  %v177_v18 = vld [vmem:[%s1401_s4 + $0x48] sm:$0xff]  ;;  %v178_v19 = vld [vmem:[%s1401_s4 + $0x50] sm:$0xff]  ;;  %vm270_vm1 = vcmask 261120   ;;  %vm1133_vm2 = vmmov 0  }
  0x1d   :  { %v179_v20 = vld [vmem:[%s1401_s4 + $0x58] sm:$0xff]  ;;  %v432_v21 = vld [vmem:[%s1403_s6] sm:$0xff]  ;;  %v433_v22 = vld [vmem:[%s1403_s6 + $0x8] sm:$0xff]  ;;  %vm861_vm3 = vcmask 64512   ;;  %vm886_vm4 = vcmask 57344  }
  0x1e   :  { %222 = vperm.xlu0 %1021, %v176_v17   ;;  %v434_v23 = vld [vmem:[%s1403_s6 + $0x10] sm:$0xff]  ;;  %v435_v24 = vld [vmem:[%s1403_s6 + $0x18] sm:$0xff]  ;;  %v436_v25 = vld [vmem:[%s1403_s6 + $0x20] sm:$0xff] }
  0x1f   :  { %227 = vperm.xlu1 %1022, %v177_v18   ;;  %v437_v26 = vld [vmem:[%s1403_s6 + $0x28] sm:$0xff]  ;;  %v438_v27 = vld [vmem:[%s1403_s6 + $0x30] sm:$0xff]  ;;  %v439_v28 = vld [vmem:[%s1403_s6 + $0x38] sm:$0xff] }
  0x20   :  { %v440_v29 = vld [vmem:[%s1403_s6 + $0x40] sm:$0xff]  ;;  %v441_v30 = vld [vmem:[%s1403_s6 + $0x48] sm:$0xff]  ;;  %v442_v31 = vld [vmem:[%s1403_s6 + $0x50] sm:$0xff] }
  0x21   :  { %v443_v32 = vld [vmem:[%s1403_s6 + $0x58] sm:$0xff]  ;;  %v687_v33 = vld [vmem:[%s1405_s8] sm:$0xff]  ;;  %v688_v34 = vld [vmem:[%s1405_s8 + $0x8] sm:$0xff] }
  0x22   :  { %232 = vperm.xlu0 %1021, %v178_v19   ;;  %v689_v35 = vld [vmem:[%s1405_s8 + $0x10] sm:$0xff]  ;;  %v690_v36 = vld [vmem:[%s1405_s8 + $0x18] sm:$0xff]  ;;  %v784_v37 = vld [vmem:[%s1407_s10] sm:$0xff] }
  0x23   :  { %237 = vperm.xlu1 %1022, %v179_v20   ;;  %v785_v38 = vld [vmem:[%s1407_s10 + $0x8] sm:$0xff]  ;;  %v847_v39 = vld [vmem:[%s1408_s11] sm:$0xff]  ;;  %v1028_v62 = vld [vmem:[%s1400_s3 + $0x10] sm:$0xff]  }
  0x24   :  { %v848_v40 = vld [vmem:[%s1408_s11 + $0x8] sm:$0xff]  ;;  %v871_v41 = vld [vmem:[#allocation2] sm:$0x1]  ;;  %v1029_v63 = vld [vmem:[%s1400_s3 + $0x18] sm:$0xff]  }
  0x25   :  { %v1026_v42 = vld [vmem:[%s1400_s3] sm:$0xff]   ;;  %v1027_v61 = vld [vmem:[%s1400_s3 + $0x8] sm:$0xff]  }
  0x26   :  { %446 = vperm.xlu0 %1021, %v432_v21   ;;  %973 = vmatprep.mubr.msk.bf16.mxu1 %vm270_vm1, %v1026_v42  ;;  %v1030_v0 = vld [vmem:[%s1400_s3 + $0x20] sm:$0xff]   ;;  %v1031_v1 = vld [vmem:[%s1400_s3 + $0x28] sm:$0xff]  }
  0x27   :  { %451 = vperm.xlu1 %1022, %v433_v22   ;;  %v1032_v2 = vld [vmem:[%s1402_s5] sm:$0xff]  }
  0x28   :  { %989 = vmatprep.mubr.msk.bf16.mxu0 %vm270_vm1, %v1032_v2 }
  0x2a   :  { %456 = vperm.xlu0 %1021, %v434_v23  }
  0x2b   :  { %461 = vperm.xlu1 %1022, %v435_v24  }
  0x2e   :  { %466 = vperm.xlu0 %1021, %v436_v25  }
  0x2f   :  { %471 = vperm.xlu1 %1022, %v437_v26  }
  0x32   :  { %476 = vperm.xlu0 %1021, %v438_v27  }
  0x33   :  { %481 = vperm.xlu1 %1022, %v439_v28  }
  0x36   :  { %486 = vperm.xlu0 %1021, %v440_v29  }
  0x37   :  { %491 = vperm.xlu1 %1022, %v441_v30  }
  0x3a   :  { %496 = vperm.xlu0 %1021, %v442_v31  }
  0x3b   :  { %501 = vperm.xlu1 %1022, %v443_v32  }
  0x3e   :  { %693 = vperm.xlu0 %1021, %v687_v33  }
  0x3f   :  { %698 = vperm.xlu1 %1022, %v688_v34  }
  0x42   :  { %703 = vperm.xlu0 %1021, %v689_v35  }
  0x43   :  { %708 = vperm.xlu1 %1022, %v690_v36  }
  0x46   :  { %788 = vperm.xlu0 %1021, %v784_v37  }
  0x47   :  { %793 = vperm.xlu1 %1022, %v785_v38  }
  0x4a   :  { %851 = vperm.xlu0 %1021, %v847_v39  }
  0x4b   :  { %856 = vperm.xlu1 %1022, %v848_v40  }
  0x4e   :  { %874 = vperm.xlu0 %1021, %v871_v41  }
  0x85   :  { %v61_v44 = vpop.permute.xlu0 %60 }
  0x86   :  { %v71_v43 = vpop.permute.xlu1 %70 }
  0x89   :  { %v66_v51 = vpop.permute.xlu0 %65 }
  0x8a   :  { %v76_v48 = vpop.permute.xlu1 %75 }
  0x8d   :  { %v183_v3 = vpop.permute.xlu0 %182 }
  0x8e   :  { %v188_v4 = vpop.permute.xlu1 %187 }
  0x91   :  { %v193_v5 = vpop.permute.xlu0 %192 }
  0x92   :  { %v198_v6 = vpop.permute.xlu1 %197 }
  0x95   :  { %v203_v7 = vpop.permute.xlu0 %202 }
  0x96   :  { %v208_v8 = vpop.permute.xlu1 %207 }
  0x99   :  { %v213_v17 = vpop.permute.xlu0 %212 }
  0x9a   :  { %v218_v21 = vpop.permute.xlu1 %217 }
  0x9d   :  { %v223_v26 = vpop.permute.xlu0 %222 }
  0x9e   :  { %v228_v31 = vpop.permute.xlu1 %227 }
  0xa1   :  { %v233_v35 = vpop.permute.xlu0 %232 }
  0xdb   :  { %v967_v45 = vpop.f32.mrb[0].mxu0 }
  0xdc   :  { %v144_v46 = vadd.f32 %v967_v45, %v71_v43  ;;  %v135_v47 = vpop.f32.mrb[1].mxu0  ;;  %v238_v43 = vpop.permute.xlu1 %237 }
  0xdd   :  { %v136_v49 = vadd.f32 %v135_v47, %v61_v44  ;;  %v968_v50 = vpop.f32.mrb[2].mxu0 }
  0xde   :  { %v147_v52 = vadd.f32 %v968_v50, %v76_v48  ;;  %v138_v53 = vpop.f32.mrb[3].mxu0  ;;  %v152_v55 = vmax.f32 %v144_v46, 0.0 }
  0xdf   :  { %v139_v54 = vadd.f32 %v138_v53, %v66_v51  ;;  %v150_v57 = vmax.f32 %v136_v49, 0.0 }
  0xe0   :  { %v153_v56 = vmax.f32 %v147_v52, 0.0 }
  0xe1   :  { %v151_v58 = vmax.f32 %v139_v54, 0.0 }
  0xe2   :  { %v167_v59 = vpack.c.bf16 %v153_v56, %v152_v55 }
  0xe3   :  { %v166_v60 = vpack.c.bf16 %v151_v58, %v150_v57 }
  0xe5   :  { %969 = vmatprep.subr.bf16.mxu1 %v166_v60 }
  0xe6   :  { %970 = vmatpush3.bf16.msra.mxu1 %v166_v60 }
  0xe7   :  { %971 = vmatprep.subr.bf16.mxu1 %v167_v59 }
  0xea   :  { %972 = vmatpush3.bf16.msra.mxu1 %v167_v59 }
  0xed   :  { %974 = vmatmul.mubr.msk.bf16.vlgmr.msra.gmra.mrb[0].mxu1 %vm270_vm1, %v1027_v61 }
  0xee   :  { %977 = vmatprep.mubr.msk.bf16.mxu1 %vm270_vm1, %v1028_v62 }
  0xf5   :  { %978 = vmatmul.mubr.msk.bf16.gmra.mrb[4].mxu1 %vm270_vm1, %v1029_v63 }
  0xf6   :  { %981 = vmatprep.mubr.msk.bf16.mxu1 %vm270_vm1, %v1030_v0 }
  0xfd   :  { %982 = vmatmul.mubr.msk.bf16.gmra.mrb[8].mxu1 %vm270_vm1, %v1031_v1 }
 0x1c0   :  { %v975_v9 = vpop.f32.mrb[0].mxu1 }
 0x1c1   :  { %v332_v10 = vadd.f32 %v975_v9, %v193_v5  ;;  %v323_v11 = vpop.f32.mrb[1].mxu1 }
 0x1c2   :  { %v324_v12 = vadd.f32 %v323_v11, %v183_v3  ;;  %v976_v13 = vpop.f32.mrb[2].mxu1 }
 0x1c3   :  { %v372_v14 = vmul.f32 0.5, %v332_v10  ;;  %v335_v15 = vadd.f32 %v976_v13, %v198_v6  ;;  %v326_v16 = vpop.f32.mrb[3].mxu1 }
 0x1c4   :  { %v370_v18 = vmul.f32 0.5, %v324_v12  ;;  %v327_v19 = vadd.f32 %v326_v16, %v188_v4 }
 0x1c5   :  { %1041 = vtanh.f32 %v372_v14  ;;  %v373_v20 = vmul.f32 0.5, %v335_v15 }
 0x1c6   :  { %1043 = vtanh.f32 %v370_v18  ;;  %v371_v22 = vmul.f32 0.5, %v327_v19 }
 0x1c7   :  { %1045 = vtanh.f32 %v373_v20 }
 0x1c8   :  { %1047 = vtanh.f32 %v371_v22  ;;  %v979_v23 = vpop.f32.mrb[4].mxu1 }
 0x1c9   :  { %v348_v24 = vadd.f32 %v979_v23, %v213_v17  ;;  %v339_v25 = vpop.f32.mrb[5].mxu1 }
 0x1ca   :  { %v340_v27 = vadd.f32 %v339_v25, %v203_v7  ;;  %v980_v28 = vpop.f32.mrb[6].mxu1  ;;  %v1033_v25 = vld [vmem:[%s1402_s5 + $0x8] sm:$0xff]  }
 0x1cb   :  { %1049 = vtanh.f32 %v348_v24  ;;  %v351_v29 = vadd.f32 %v980_v28, %v218_v21  ;;  %v342_v30 = vpop.f32.mrb[7].mxu1  ;;  %v1036_v28 = vld [vmem:[%s1402_s5 + $0x20] sm:$0xff]  }
 0x1cc   :  { %1051 = vtanh.f32 %v340_v27  ;;  %v343_v32 = vadd.f32 %v342_v30, %v208_v8  ;;  %v1035_v27 = vld [vmem:[%s1402_s5 + $0x18] sm:$0xff]   ;;  %v1038_v30 = vld [vmem:[%s1404_s7] sm:$0xff]  }
 0x1cd   :  { %1053 = vtanh.f32 %v351_v29  ;;  %v1037_v29 = vld [vmem:[%s1402_s5 + $0x28] sm:$0xff]   ;;  %1005 = vmatprep.mubr.msk.bf16.mxu1 %vm270_vm1, %v1038_v30 }
 0x1ce   :  { %1055 = vtanh.f32 %v343_v32  ;;  %v452_v32 = vpop.permute.xlu1 %451 }
 0x1cf   :  { %v1042_v33 = vpop.eup %1041 }
 0x1d0   :  { %v1044_v34 = vpop.eup %1043  ;;  %v380_v36 = vmul.f32 0.5, %v1042_v33  ;;  %v983_v37 = vpop.f32.mrb[8].mxu1 }
 0x1d1   :  { %v1046_v38 = vpop.eup %1045  ;;  %v378_v39 = vmul.f32 0.5, %v1044_v34  ;;  %v364_v40 = vadd.f32 %v983_v37, %v233_v35  ;;  %v355_v41 = vpop.f32.mrb[9].mxu1 }
 0x1d2   :  { %v1048_v42 = vpop.eup %1047  ;;  %v381_v44 = vmul.f32 0.5, %v1046_v38  ;;  %v356_v45 = vadd.f32 %v355_v41, %v223_v26  ;;  %v984_v46 = vpop.f32.mrb[10].mxu1  ;;  %v384_v51 = vadd.f32 0.5, %v380_v36  ;;  %v1034_v26 = vld [vmem:[%s1402_s5 + $0x10] sm:$0xff]  }
 0x1d3   :  { %v379_v47 = vmul.f32 0.5, %v1048_v42  ;;  %v392_v48 = vmul.f32 0.5, %v364_v40  ;;  %v367_v49 = vadd.f32 %v984_v46, %v238_v43  ;;  %v358_v50 = vpop.f32.mrb[11].mxu1  ;;  %v382_v55 = vadd.f32 0.5, %v378_v39  ;;  %v462_v34 = vpop.permute.xlu1 %461 }
 0x1d4   :  { %v390_v52 = vmul.f32 0.5, %v356_v45  ;;  %v359_v53 = vadd.f32 %v358_v50, %v228_v31  ;;  %v385_v58 = vadd.f32 0.5, %v381_v44  ;;  %v447_v31 = vpop.permute.xlu0 %446 }
 0x1d5   :  { %v1050_v54 = vpop.eup %1049  ;;  %1057 = vtanh.f32 %v392_v48  ;;  %v393_v56 = vmul.f32 0.5, %v367_v49  ;;  %v383_v61 = vadd.f32 0.5, %v379_v47 }
 0x1d6   :  { %v1052_v57 = vpop.eup %1051  ;;  %v408_v59 = vmul.f32 %v1050_v54, %v384_v51  ;;  %1059 = vtanh.f32 %v390_v52  ;;  %v391_v1 = vmul.f32 0.5, %v359_v53 }
 0x1d7   :  { %v1054_v60 = vpop.eup %1053  ;;  %v406_v62 = vmul.f32 %v1052_v57, %v382_v55  ;;  %1061 = vtanh.f32 %v393_v56  ;;  %v472_v36 = vpop.permute.xlu1 %471 }
 0x1d8   :  { %v1056_v63 = vpop.eup %1055  ;;  %1063 = vtanh.f32 %v408_v59  ;;  %v409_v0 = vmul.f32 %v1054_v60, %v385_v58  ;;  %v457_v33 = vpop.permute.xlu0 %456 }
 0x1d9   :  { %1065 = vtanh.f32 %v406_v62  ;;  %v407_v2 = vmul.f32 %v1056_v63, %v383_v61 }
 0x1da   :  { %1067 = vtanh.f32 %v409_v0 }
 0x1db   :  { %1069 = vtanh.f32 %v391_v1  ;;  %v482_v49 = vpop.permute.xlu1 %481 }
 0x1dc   :  { %1071 = vtanh.f32 %v407_v2  ;;  %v467_v35 = vpop.permute.xlu0 %466 }
 0x1df   :  { %v1058_v3 = vpop.eup %1057  ;;  %v492_v59 = vpop.permute.xlu1 %491 }
 0x1e0   :  { %v1060_v4 = vpop.eup %1059  ;;  %v400_v5 = vmul.f32 0.5, %v1058_v3  ;;  %v477_v45 = vpop.permute.xlu0 %476 }
 0x1e1   :  { %v1062_v6 = vpop.eup %1061  ;;  %v398_v7 = vmul.f32 0.5, %v1060_v4 }
 0x1e2   :  { %v1064_v8 = vpop.eup %1063  ;;  %v404_v9 = vadd.f32 0.5, %v400_v5  ;;  %v401_v10 = vmul.f32 0.5, %v1062_v6 }
 0x1e3   :  { %v1066_v11 = vpop.eup %1065  ;;  %v402_v12 = vadd.f32 0.5, %v398_v7  ;;  %v502_v7 = vpop.permute.xlu1 %501 }
 0x1e4   :  { %v1068_v13 = vpop.eup %1067  ;;  %v405_v14 = vadd.f32 0.5, %v401_v10  ;;  %v416_v15 = vmul.f32 %v1064_v8, %v404_v9  ;;  %v487_v54 = vpop.permute.xlu0 %486 }
 0x1e5   :  { %v414_v16 = vmul.f32 %v1066_v11, %v402_v12  ;;  %v1070_v17 = vpop.eup %1069 }
 0x1e6   :  { %v417_v18 = vmul.f32 %v1068_v13, %v405_v14  ;;  %v399_v19 = vmul.f32 0.5, %v1070_v17  ;;  %v1072_v20 = vpop.eup %1071 }
 0x1e8   :  { %v431_v21 = vpack.c.bf16 %v417_v18, %v416_v15  ;;  %v403_v22 = vadd.f32 0.5, %v399_v19  ;;  %v497_v63 = vpop.permute.xlu0 %496 }
 0x1ea   :  { %v415_v23 = vmul.f32 %v1072_v20, %v403_v22 }
 0x1ec   :  { %v430_v24 = vpack.c.bf16 %v415_v23, %v414_v16 }
 0x1ee   :  { %985 = vmatprep.subr.bf16.mxu0 %v430_v24 }
 0x1ef   :  { %986 = vmatpush3.bf16.msra.mxu0 %v430_v24 }
 0x1f0   :  { %987 = vmatprep.subr.bf16.mxu0 %v431_v21 }
 0x1f3   :  { %988 = vmatpush3.bf16.msra.mxu0 %v431_v21 }
 0x1f6   :  { %990 = vmatmul.mubr.msk.bf16.vlgmr.msra.gmra.mrb[4].mxu0 %vm270_vm1, %v1033_v25 }
 0x1f7   :  { %993 = vmatprep.mubr.msk.bf16.mxu0 %vm270_vm1, %v1034_v26 }
 0x1fe   :  { %994 = vmatmul.mubr.msk.bf16.gmra.mrb[8].mxu0 %vm270_vm1, %v1035_v27 }
 0x1ff   :  { %997 = vmatprep.mubr.msk.bf16.mxu0 %vm270_vm1, %v1036_v28 }
 0x206   :  { %998 = vmatmul.mubr.msk.bf16.gmra.mrb[12].mxu0 %vm270_vm1, %v1037_v29 }
 0x2c9   :  { %v991_v37 = vpop.f32.mrb[4].mxu0 }
 0x2ca   :  { %v595_v38 = vadd.f32 %v991_v37, %v457_v33  ;;  %v586_v39 = vpop.f32.mrb[5].mxu0 }
 0x2cb   :  { %v587_v40 = vadd.f32 %v586_v39, %v447_v31  ;;  %v992_v41 = vpop.f32.mrb[6].mxu0 }
 0x2cc   :  { %v635_v42 = vmul.f32 0.5, %v595_v38  ;;  %v598_v43 = vadd.f32 %v992_v41, %v462_v34  ;;  %v589_v44 = vpop.f32.mrb[7].mxu0 }
 0x2cd   :  { %v633_v46 = vmul.f32 0.5, %v587_v40  ;;  %v590_v47 = vadd.f32 %v589_v44, %v452_v32 }
 0x2ce   :  { %1073 = vtanh.f32 %v635_v42  ;;  %v636_v48 = vmul.f32 0.5, %v598_v43 }
 0x2cf   :  { %1075 = vtanh.f32 %v633_v46  ;;  %v634_v50 = vmul.f32 0.5, %v590_v47 }
 0x2d0   :  { %1077 = vtanh.f32 %v636_v48 }
 0x2d1   :  { %1079 = vtanh.f32 %v634_v50  ;;  %v995_v51 = vpop.f32.mrb[8].mxu0 }
 0x2d2   :  { %v611_v52 = vadd.f32 %v995_v51, %v477_v45  ;;  %v602_v53 = vpop.f32.mrb[9].mxu0 }
 0x2d3   :  { %v603_v55 = vadd.f32 %v602_v53, %v467_v35  ;;  %v996_v56 = vpop.f32.mrb[10].mxu0  ;;  %v1039_v53 = vld [vmem:[%s1404_s7 + $0x8] sm:$0xff]  }
 0x2d4   :  { %1081 = vtanh.f32 %v611_v52  ;;  %v614_v57 = vadd.f32 %v996_v56, %v482_v49  ;;  %v605_v58 = vpop.f32.mrb[11].mxu0  ;;  %v699_v56 = vpop.permute.xlu1 %698 }
 0x2d5   :  { %1083 = vtanh.f32 %v603_v55  ;;  %v606_v60 = vadd.f32 %v605_v58, %v472_v36  ;;  %v694_v55 = vpop.permute.xlu0 %693 }
 0x2d6   :  { %1085 = vtanh.f32 %v614_v57 }
 0x2d7   :  { %1087 = vtanh.f32 %v606_v60 }
 0x2d8   :  { %v1074_v61 = vpop.eup %1073 }
 0x2d9   :  { %v1076_v62 = vpop.eup %1075  ;;  %v643_v0 = vmul.f32 0.5, %v1074_v61  ;;  %v999_v1 = vpop.f32.mrb[12].mxu0 }
 0x2da   :  { %v1078_v2 = vpop.eup %1077  ;;  %v641_v3 = vmul.f32 0.5, %v1076_v62  ;;  %v627_v4 = vadd.f32 %v999_v1, %v497_v63  ;;  %v618_v5 = vpop.f32.mrb[13].mxu0 }
 0x2db   :  { %v1080_v6 = vpop.eup %1079  ;;  %v644_v8 = vmul.f32 0.5, %v1078_v2  ;;  %v619_v9 = vadd.f32 %v618_v5, %v487_v54  ;;  %v1000_v10 = vpop.f32.mrb[14].mxu0  ;;  %v647_v15 = vadd.f32 0.5, %v643_v0  ;;  %v1132_v54 = vmov 0.0  }
 0x2dc   :  { %v642_v11 = vmul.f32 0.5, %v1080_v6  ;;  %v655_v12 = vmul.f32 0.5, %v627_v4  ;;  %v630_v13 = vadd.f32 %v1000_v10, %v502_v7  ;;  %v621_v14 = vpop.f32.mrb[15].mxu0  ;;  %v645_v19 = vadd.f32 0.5, %v641_v3  ;;  %1009 = vmatprep.subr.bf16.mxu0 %v1132_v54  ;;  %1013 = vmatprep.mubr.msk.bf16.mxu0 %vm1133_vm2, %v1132_v54  ;;  %v704_v57 = vpop.permute.xlu0 %703 }
 0x2dd   :  { %v653_v16 = vmul.f32 0.5, %v619_v9  ;;  %v622_v17 = vadd.f32 %v621_v14, %v492_v59  ;;  %v648_v22 = vadd.f32 0.5, %v644_v8  ;;  %v709_v61 = vpop.permute.xlu1 %708  ;;  %v1040_v9 = vld [vmem:[%s1406_s9] sm:$0xff]   ;;  %s1134_s9 = smov [#allocation3]  }
 0x2de   :  { %v1082_v18 = vpop.eup %1081  ;;  %1089 = vtanh.f32 %v655_v12  ;;  %v656_v20 = vmul.f32 0.5, %v630_v13  ;;  %v646_v25 = vadd.f32 0.5, %v642_v11  ;;  %s894_s1 = sshll.u32 %s1134_s9, 4  ;;  %s895_s1 = int_to_ptr.vmem [resolvable:$true] %s894_s1 }
 0x2df   :  { %v1084_v21 = vpop.eup %1083  ;;  %v671_v23 = vmul.f32 %v1082_v18, %v647_v15  ;;  %1091 = vtanh.f32 %v653_v16  ;;  %v654_v29 = vmul.f32 0.5, %v622_v17  ;;  %s1107_s10 = scalar_lea.vmem %s895_s1, 16  ;;  %s1111_s11 = scalar_lea.vmem %s895_s1, 32 }
 0x2e0   :  { %v1086_v24 = vpop.eup %1085  ;;  %v669_v26 = vmul.f32 %v1084_v21, %v645_v19  ;;  %1093 = vtanh.f32 %v656_v20  ;;  %v789_v10 = vpop.permute.xlu0 %788  ;;  %p1108_p0 = scmp.ne.s32.totalorder %s895_s1, %s1107_s10  ;;  %p1112_p1 = scmp.lt.s32.totalorder %s895_s1, %s895_s1 }
 0x2e1   :  { %v1088_v27 = vpop.eup %1087  ;;  %1095 = vtanh.f32 %v671_v23  ;;  %v672_v28 = vmul.f32 %v1086_v24, %v648_v22  ;;  %v794_v11 = vpop.permute.xlu1 %793  ;;  %p1113_p2 = scmp.lt.s32.totalorder %s1111_s11, %s1107_s10 }
 0x2e2   :  { %1097 = vtanh.f32 %v669_v26  ;;  %v670_v30 = vmul.f32 %v1088_v27, %v646_v25  ;;  %v877_v26 = vlaneseq }
 0x2e3   :  { %1099 = vtanh.f32 %v672_v28  ;;  %p1114_p3 = por %p1113_p2, %p1112_p1 }
 0x2e4   :  { %1101 = vtanh.f32 %v654_v29  ;;  %v852_v19 = vpop.permute.xlu0 %851  ;;  %v878_v29 = vshrl.u32 %v877_v26, 7 }
 0x2e5   :  { %1103 = vtanh.f32 %v670_v30  ;;  %v857_v22 = vpop.permute.xlu1 %856  ;;  %p1115_p4 = pnand %p1114_p3, %p1108_p0 }
 0x2e8   :  { %v1090_v31 = vpop.eup %1089 }
 0x2e9   :  { %v1092_v32 = vpop.eup %1091  ;;  %v663_v33 = vmul.f32 0.5, %v1090_v31 }
 0x2ea   :  { %v1094_v34 = vpop.eup %1093  ;;  %v661_v35 = vmul.f32 0.5, %v1092_v32  ;;  %v879_v32 = vsub.s32 0, %v878_v29 }
 0x2eb   :  { %v1096_v36 = vpop.eup %1095  ;;  %v667_v37 = vadd.f32 0.5, %v663_v33  ;;  %v664_v38 = vmul.f32 0.5, %v1094_v34  ;;  %v875_v34 = vpop.permute.xlu0 %874 }
 0x2ec   :  { %v1098_v39 = vpop.eup %1097  ;;  %v665_v40 = vadd.f32 0.5, %v661_v35 }
 0x2ed   :  { %v1100_v41 = vpop.eup %1099  ;;  %v668_v42 = vadd.f32 0.5, %v664_v38  ;;  %v679_v43 = vmul.f32 %v1096_v36, %v667_v37  ;;  %v880_v36 = vrot.slane %v875_v34, %v879_v32 }
 0x2ee   :  { %v677_v44 = vmul.f32 %v1098_v39, %v665_v40  ;;  %v1102_v45 = vpop.eup %1101 }
 0x2ef   :  { %v680_v46 = vmul.f32 %v1100_v41, %v668_v42  ;;  %v662_v47 = vmul.f32 0.5, %v1102_v45  ;;  %v1104_v48 = vpop.eup %1103 }
 0x2f1   :  { %v686_v49 = vpack.c.bf16 %v680_v46, %v679_v43  ;;  %v666_v50 = vadd.f32 0.5, %v662_v47 }
 0x2f3   :  { %v678_v51 = vmul.f32 %v1104_v48, %v666_v50 }
 0x2f5   :  { %v685_v52 = vpack.c.bf16 %v678_v51, %v677_v44 }
 0x2f7   :  { %1001 = vmatprep.subr.bf16.mxu1 %v685_v52 }
 0x2f8   :  { %1002 = vmatpush3.bf16.msra.mxu1 %v685_v52 }
 0x2f9   :  { %1003 = vmatprep.subr.bf16.mxu1 %v686_v49 }
 0x2fc   :  { %1004 = vmatpush3.bf16.msra.mxu1 %v686_v49 }
 0x2ff   :  { %1006 = vmatmul.mubr.msk.bf16.vlgmr.msra.gmra.mrb[12].mxu1 %vm270_vm1, %v1039_v53 }
 0x3d2   :  { %v1007_v58 = vpop.f32.mrb[12].mxu1 }
 0x3d3   :  { %v770_v59 = vadd.f32 %v1007_v58, %v704_v57  ;;  %v761_v60 = vpop.f32.mrb[13].mxu1 }
 0x3d4   :  { %v762_v62 = vadd.f32 %v761_v60, %v694_v55  ;;  %v1008_v63 = vpop.f32.mrb[14].mxu1 }
 0x3d5   :  { %v773_v0 = vadd.f32 %v1008_v63, %v709_v61  ;;  %v764_v1 = vpop.f32.mrb[15].mxu1  ;;  %v778_v3 = vmax.f32 %v770_v59, 0.0 }
 0x3d6   :  { %v765_v2 = vadd.f32 %v764_v1, %v699_v56  ;;  %v776_v5 = vmax.f32 %v762_v62, 0.0 }
 0x3d7   :  { %v779_v4 = vmax.f32 %v773_v0, 0.0 }
 0x3d8   :  { %v777_v6 = vmax.f32 %v765_v2, 0.0 }
 0x3d9   :  { %v783_v7 = vpack.c.bf16 %v779_v4, %v778_v3 }
 0x3da   :  { %v782_v8 = vpack.c.bf16 %v777_v6, %v776_v5 }
 0x3dc   :  { %1010 = vmatpush3.bf16.msra.mxu0 %v782_v8 }
 0x3dd   :  { %1011 = vmatprep.subr.bf16.mxu0 %v1132_v54 }
 0x3e0   :  { %1012 = vmatpush3.bf16.msra.mxu0 %v783_v7 }
 0x3e3   :  { %1014 = vmatmul.mubr.msk.bf16.vlgmr.msra.gmra.mrb[16].mxu0 %vm270_vm1, %v1040_v9 }
 0x4b6   :  { %v838_v12 = vpop.f32.mrb[16].mxu0 }
 0x4b7   :  { %v839_v13 = vadd.f32 %v838_v12, %v789_v10  ;;  %v1015_v14 = vpop.f32.mrb[17].mxu0 }
 0x4b8   :  { %v841_v15 = vpop.f32.mrb[18].mxu0 }
 0x4b9   :  { %v845_v16 = vmax.f32 %v839_v13, 0.0  ;;  %v842_v17 = vadd.f32 %v841_v15, %v794_v11  ;;  %v1016_v18 = vpop.f32.mrb[19].mxu0 }
 0x4bb   :  { %v859_v20 = vmul.f32 %v852_v19, %v845_v16  ;;  %v846_v21 = vmax.f32 %v842_v17, 0.0 }
 0x4bd   :  { %v860_v23 = vmul.f32 %v857_v22, %v846_v21  ;;  %v862_v24 = vsel %vm861_vm3, %v859_v20, 0.0 }
 0x4bf   :  { %v863_v25 = vsel %vm861_vm3, %v860_v23, 0.0 }
 0x4c0   :  { %v864_v27 = vadd.f32 %v863_v25, %v862_v24 }
 0x4c2   :  { %v865_v28 = vrot.slane %v864_v27, 4 }
 0x4c4   :  { %v866_v30 = vadd.f32 %v865_v28, %v864_v27 }
 0x4c6   :  { %v867_v31 = vrot.slane %v866_v30, 2 }
 0x4c8   :  { %v868_v33 = vadd.f32 %v867_v31, %v866_v30 }
 0x4ca   :  { %v869_v35 = vrot.slane %v868_v33, 1 }
 0x4cc   :  { %v870_v37 = vadd.f32 %v869_v35, %v868_v33 }
 0x4ce   :  { %v881_v38 = vadd.f32 %v880_v36, %v870_v37 }
 0x4d0   :  { %v882_v39 = vmul.f32 0.5, %v881_v38 }
 0x4d2   :  { %1105 = vtanh.f32 %v882_v39 }
 0x4dc   :  { %v1106_v40 = vpop.eup %1105 }
 0x4dd   :  { %v884_v41 = vmul.f32 0.5, %v1106_v40 }
 0x4df   :  { %v885_v42 = vadd.f32 0.5, %v884_v41 }
 0x4e1   :  { %887 = vst.msk [vmem:[#allocation3] sm:$0x1] %vm886_vm4, %v885_v42 }
 0x4e2   :  { %1118 = shalt.err (!%p1115_p4)
}
 0x4e3   :  { %s1119_s22 = scalar_lea.hbm %s1410_s13, 16 }
 0x4e4   :  { %p1120_p5 = scmp.ne.s32.totalorder %s1410_s13, %s1119_s22  ;;  %p1123_p6 = scmp.lt.u32.totalorder %s1119_s22, %s1410_s13 }
 0x4e6   :  { %p1125_p7 = pnand %p1123_p6, %p1120_p5 }
 0x4e8   :  { %1128 = shalt.err (!%p1125_p7)
}
 0x4e9   :  { %897 = dma.vmem_to_hbm [thread:$0]  %s895_s1, 16, %s1410_s13, [#allocation4]  }
 0x4ea   :  { %1129 = dma.done.wait [#allocation4], 16  }
 0x4eb   :  { %1130 = vsyncadd [#allocation4], 4294967280 }
 0x4ec   :  { %901 = vsyncpa [#allocation4], 1 }

</bundles_post_ra>
